<compile_context>
chip_gen: v5e
topology: v5e:2x2
jax: 0.10.0
libtpu: 0.0.40
codegen_flags: <defaults>
</compile_context>

<pallas_src>
import functools

import jax
import jax.numpy as jnp
from jax.experimental import pallas as pl
from jax.experimental.pallas import tpu as pltpu


SB = 8        # batch sublanes per grid block -> dense (8, lanes) per-feature tiles
CL_MAX = 512  # lanes per in-kernel chunk (keeps live vregs well under the 64 budget)


def mlp_kernel(w1_ref, b1_ref, w2_ref, b2_ref, w3_ref, b3_ref, x_ref, o_ref, *, cl):
    """x_ref: (8_features, SB, TB_L) f32 VMEM block (batch packed over sublanes+lanes).
    w*_ref: (in, out) f32 SMEM; b*_ref: (out,) f32 SMEM.
    o_ref: (SB, TB_L) f32 dense output block."""
    # Hoist every SMEM scalar read once per grid step (outside the chunk loop).
    w1 = [[w1_ref[i, j] for j in range(6)] for i in range(8)]
    b1 = [b1_ref[j] for j in range(6)]
    w2 = [[w2_ref[i, j] for j in range(4)] for i in range(6)]
    b2 = [b2_ref[j] for j in range(4)]
    w3 = [w3_ref[i, 0] for i in range(4)]
    b3 = b3_ref[0]

    def sigmoid(z):
        # Exact identity: sigmoid(z) = 0.5 * tanh(z / 2) + 0.5  -> single EUP op.
        return 0.5 * jnp.tanh(0.5 * z) + 0.5

    n_chunks = x_ref.shape[2] // cl

    @pl.loop(0, n_chunks)
    def _(c):
        off = pl.multiple_of(c * cl, cl)

        # Layer 1: 8 -> 6.  Load each x feature row lazily so at most one (SB, cl)
        # x-tile plus the 6 accumulators are live at a time.
        z1 = [None] * 6
        for i in range(8):
            xi = x_ref[i, :, pl.ds(off, cl)]          # dense (SB, cl) tile
            for j in range(6):
                t = xi * w1[i][j]
                z1[j] = t if i == 0 else z1[j] + t
        h1 = [sigmoid(z1[j] + b1[j]) for j in range(6)]

        # Layer 2: 6 -> 4.
        h2 = []
        for j in range(4):
            z = h1[0] * w2[0][j]
            for i in range(1, 6):
                z = z + h1[i] * w2[i][j]
            h2.append(sigmoid(z + b2[j]))

        # Layer 3: 4 -> 1.
        z = h2[0] * w3[0]
        for i in range(1, 4):
            z = z + h2[i] * w3[i]
        o_ref[:, pl.ds(off, cl)] = sigmoid(z + b3).astype(o_ref.dtype)


def _round_up(a, b):
    return ((a + b - 1) // b) * b


def mlp_forward(x, w1, b1, w2, b2, w3, b3, *, block_lanes=4096):
    """x: (B, 8) f32.  Weights are (in, out) (transposed vs. torch.nn.Linear's
    (out, in) layout); biases are (out,).  Returns (B, 1) f32."""
    B, F = x.shape
    assert F == 8

    # Lane width per sublane-row: multiple of 128; sized so large batches get >=2
    # grid blocks (dual-TC sharding on v7x via "parallel"); >CL_MAX widths rounded
    # to a multiple of the chunk size so the in-kernel loop tiles exactly.
    tb_l = min(max(128, _round_up(pl.cdiv(B, 2 * SB), 128)), block_lanes)
    if tb_l > CL_MAX:
        tb_l = _round_up(tb_l, CL_MAX)
    cl = min(CL_MAX, tb_l)

    rows = _round_up(pl.cdiv(B, tb_l), SB)      # batch sublane-rows, multiple of SB
    n_blocks = rows // SB
    b_pad = rows * tb_l

    # Feature-major repack: (B, 8) -> (8, rows, tb_l); batch b maps to (s, l) with
    # b = s * tb_l + l.  Padded tail entries are zero; their outputs are junk
    # (sigmoid of biases) and are sliced off below — never reduce over them.
    # TODO(synk): a feature-major producer upstream would remove this extra HBM pass.
    xt = jnp.zeros((F, b_pad), jnp.float32).at[:, :B].set(x.T.astype(jnp.float32))
    xt = xt.reshape(F, rows, tb_l)

    smem = pl.BlockSpec(memory_space=pltpu.MemorySpace.SMEM)
    out = pl.pallas_call(
        functools.partial(mlp_kernel, cl=cl),
        out_shape=jax.ShapeDtypeStruct((rows, tb_l), jnp.float32),
        grid=(n_blocks,),
        in_specs=[smem] * 6 + [pl.BlockSpec((F, SB, tb_l), lambda i: (0, i, 0))],
        out_specs=pl.BlockSpec((SB, tb_l), lambda i: (i, 0)),
        compiler_params=pltpu.CompilerParams(
            dimension_semantics=("parallel",),
        ),
        cost_estimate=pl.CostEstimate(
            flops=152 * b_pad,             # 2 * (8*6 + 6*4 + 4*1) per element
            transcendentals=11 * b_pad,    # one tanh per activation
            bytes_accessed=36 * b_pad,     # 32 B read + 4 B written per element
        ),
    )(w1, b1, w2, b2, w3, b3, xt)

    return out.reshape(-1)[:B].reshape(B, 1)


def init_params(key):
    # Deterministic init mimicking torch.nn.Linear (uniform in +/- 1/sqrt(fan_in)),
    # stored as (in, out) / (out,).
    def linear(key, fan_in, fan_out):
        kw, kb = jax.random.split(key)
        bound = 1.0 / jnp.sqrt(fan_in)
        w = jax.random.uniform(kw, (fan_in, fan_out), jnp.float32, -bound, bound)
        b = jax.random.uniform(kb, (fan_out,), jnp.float32, -bound, bound)
        return w, b

    k1, k2, k3 = jax.random.split(key, 3)
    w1, b1 = linear(k1, 8, 6)
    w2, b2 = linear(k2, 6, 4)
    w3, b3 = linear(k3, 4, 1)
    return w1, b1, w2, b2, w3, b3


if __name__ == "__main__":
    key = jax.random.PRNGKey(0)
    kx, kp = jax.random.split(key)

    B = 8
    x = jax.random.normal(kx, (B, 8), jnp.float32)
    w1, b1, w2, b2, w3, b3 = init_params(kp)

    out = mlp_forward(x, w1, b1, w2, b2, w3, b3)
    out = jax.block_until_ready(out)

    # Pure-JAX reference.
    ref = jax.nn.sigmoid(x @ w1 + b1)
    ref = jax.nn.sigmoid(ref @ w2 + b2)
    ref = jax.nn.sigmoid(ref @ w3 + b3)
    assert out.shape == (B, 1)
    assert jnp.allclose(out, ref, atol=1e-5, rtol=1e-5), (
        float(jnp.max(jnp.abs(out - ref))))

    print("KERNEL_OK")
</pallas_src>

<mosaic_0001>
module attributes {stable_mosaic.version = 11 : i64} {
  func.func @mlp_kernel(%arg0: i32, %arg1: memref<8x6xf32, #tpu.memory_space<smem>>, %arg2: memref<6xf32, #tpu.memory_space<smem>>, %arg3: memref<6x4xf32, #tpu.memory_space<smem>>, %arg4: memref<4xf32, #tpu.memory_space<smem>>, %arg5: memref<4x1xf32, #tpu.memory_space<smem>>, %arg6: memref<1xf32, #tpu.memory_space<smem>>, %arg7: memref<8x8x128xf32, #tpu.memory_space<vmem>>, %arg8: memref<8x128xf32, #tpu.memory_space<vmem>>) attributes {dimension_semantics = [#tpu.dimension_semantics<parallel>], iteration_bounds = array<i64: 1>, scalar_prefetch = 0 : i64, scratch_operands = 0 : i64, tpu.core_type = #tpu.core_type<tc>, window_params = [{transform_indices = @transform_0, window_bounds = array<i64: 8, 6>}, {transform_indices = @transform_1, window_bounds = array<i64: 6>}, {transform_indices = @transform_2, window_bounds = array<i64: 6, 4>}, {transform_indices = @transform_3, window_bounds = array<i64: 4>}, {transform_indices = @transform_4, window_bounds = array<i64: 4, 1>}, {transform_indices = @transform_5, window_bounds = array<i64: 1>}, {transform_indices = @transform_6, window_bounds = array<i64: 8, 8, 128>}, {transform_indices = @transform_7, window_bounds = array<i64: 8, 128>}]} {
    %c0 = arith.constant 0 : index
    %c0_0 = arith.constant 0 : index
    %0 = memref.load %arg1[%c0, %c0_0] : memref<8x6xf32, #tpu.memory_space<smem>>
    %c0_1 = arith.constant 0 : index
    %c1 = arith.constant 1 : index
    %1 = memref.load %arg1[%c0_1, %c1] : memref<8x6xf32, #tpu.memory_space<smem>>
    %c0_2 = arith.constant 0 : index
    %c2 = arith.constant 2 : index
    %2 = memref.load %arg1[%c0_2, %c2] : memref<8x6xf32, #tpu.memory_space<smem>>
    %c0_3 = arith.constant 0 : index
    %c3 = arith.constant 3 : index
    %3 = memref.load %arg1[%c0_3, %c3] : memref<8x6xf32, #tpu.memory_space<smem>>
    %c0_4 = arith.constant 0 : index
    %c4 = arith.constant 4 : index
    %4 = memref.load %arg1[%c0_4, %c4] : memref<8x6xf32, #tpu.memory_space<smem>>
    %c0_5 = arith.constant 0 : index
    %c5 = arith.constant 5 : index
    %5 = memref.load %arg1[%c0_5, %c5] : memref<8x6xf32, #tpu.memory_space<smem>>
    %c1_6 = arith.constant 1 : index
    %c0_7 = arith.constant 0 : index
    %6 = memref.load %arg1[%c1_6, %c0_7] : memref<8x6xf32, #tpu.memory_space<smem>>
    %c1_8 = arith.constant 1 : index
    %c1_9 = arith.constant 1 : index
    %7 = memref.load %arg1[%c1_8, %c1_9] : memref<8x6xf32, #tpu.memory_space<smem>>
    %c1_10 = arith.constant 1 : index
    %c2_11 = arith.constant 2 : index
    %8 = memref.load %arg1[%c1_10, %c2_11] : memref<8x6xf32, #tpu.memory_space<smem>>
    %c1_12 = arith.constant 1 : index
    %c3_13 = arith.constant 3 : index
    %9 = memref.load %arg1[%c1_12, %c3_13] : memref<8x6xf32, #tpu.memory_space<smem>>
    %c1_14 = arith.constant 1 : index
    %c4_15 = arith.constant 4 : index
    %10 = memref.load %arg1[%c1_14, %c4_15] : memref<8x6xf32, #tpu.memory_space<smem>>
    %c1_16 = arith.constant 1 : index
    %c5_17 = arith.constant 5 : index
    %11 = memref.load %arg1[%c1_16, %c5_17] : memref<8x6xf32, #tpu.memory_space<smem>>
    %c2_18 = arith.constant 2 : index
    %c0_19 = arith.constant 0 : index
    %12 = memref.load %arg1[%c2_18, %c0_19] : memref<8x6xf32, #tpu.memory_space<smem>>
    %c2_20 = arith.constant 2 : index
    %c1_21 = arith.constant 1 : index
    %13 = memref.load %arg1[%c2_20, %c1_21] : memref<8x6xf32, #tpu.memory_space<smem>>
    %c2_22 = arith.constant 2 : index
    %c2_23 = arith.constant 2 : index
    %14 = memref.load %arg1[%c2_22, %c2_23] : memref<8x6xf32, #tpu.memory_space<smem>>
    %c2_24 = arith.constant 2 : index
    %c3_25 = arith.constant 3 : index
    %15 = memref.load %arg1[%c2_24, %c3_25] : memref<8x6xf32, #tpu.memory_space<smem>>
    %c2_26 = arith.constant 2 : index
    %c4_27 = arith.constant 4 : index
    %16 = memref.load %arg1[%c2_26, %c4_27] : memref<8x6xf32, #tpu.memory_space<smem>>
    %c2_28 = arith.constant 2 : index
    %c5_29 = arith.constant 5 : index
    %17 = memref.load %arg1[%c2_28, %c5_29] : memref<8x6xf32, #tpu.memory_space<smem>>
    %c3_30 = arith.constant 3 : index
    %c0_31 = arith.constant 0 : index
    %18 = memref.load %arg1[%c3_30, %c0_31] : memref<8x6xf32, #tpu.memory_space<smem>>
    %c3_32 = arith.constant 3 : index
    %c1_33 = arith.constant 1 : index
    %19 = memref.load %arg1[%c3_32, %c1_33] : memref<8x6xf32, #tpu.memory_space<smem>>
    %c3_34 = arith.constant 3 : index
    %c2_35 = arith.constant 2 : index
    %20 = memref.load %arg1[%c3_34, %c2_35] : memref<8x6xf32, #tpu.memory_space<smem>>
    %c3_36 = arith.constant 3 : index
    %c3_37 = arith.constant 3 : index
    %21 = memref.load %arg1[%c3_36, %c3_37] : memref<8x6xf32, #tpu.memory_space<smem>>
    %c3_38 = arith.constant 3 : index
    %c4_39 = arith.constant 4 : index
    %22 = memref.load %arg1[%c3_38, %c4_39] : memref<8x6xf32, #tpu.memory_space<smem>>
    %c3_40 = arith.constant 3 : index
    %c5_41 = arith.constant 5 : index
    %23 = memref.load %arg1[%c3_40, %c5_41] : memref<8x6xf32, #tpu.memory_space<smem>>
    %c4_42 = arith.constant 4 : index
    %c0_43 = arith.constant 0 : index
    %24 = memref.load %arg1[%c4_42, %c0_43] : memref<8x6xf32, #tpu.memory_space<smem>>
    %c4_44 = arith.constant 4 : index
    %c1_45 = arith.constant 1 : index
    %25 = memref.load %arg1[%c4_44, %c1_45] : memref<8x6xf32, #tpu.memory_space<smem>>
    %c4_46 = arith.constant 4 : index
    %c2_47 = arith.constant 2 : index
    %26 = memref.load %arg1[%c4_46, %c2_47] : memref<8x6xf32, #tpu.memory_space<smem>>
    %c4_48 = arith.constant 4 : index
    %c3_49 = arith.constant 3 : index
    %27 = memref.load %arg1[%c4_48, %c3_49] : memref<8x6xf32, #tpu.memory_space<smem>>
    %c4_50 = arith.constant 4 : index
    %c4_51 = arith.constant 4 : index
    %28 = memref.load %arg1[%c4_50, %c4_51] : memref<8x6xf32, #tpu.memory_space<smem>>
    %c4_52 = arith.constant 4 : index
    %c5_53 = arith.constant 5 : index
    %29 = memref.load %arg1[%c4_52, %c5_53] : memref<8x6xf32, #tpu.memory_space<smem>>
    %c5_54 = arith.constant 5 : index
    %c0_55 = arith.constant 0 : index
    %30 = memref.load %arg1[%c5_54, %c0_55] : memref<8x6xf32, #tpu.memory_space<smem>>
    %c5_56 = arith.constant 5 : index
    %c1_57 = arith.constant 1 : index
    %31 = memref.load %arg1[%c5_56, %c1_57] : memref<8x6xf32, #tpu.memory_space<smem>>
    %c5_58 = arith.constant 5 : index
    %c2_59 = arith.constant 2 : index
    %32 = memref.load %arg1[%c5_58, %c2_59] : memref<8x6xf32, #tpu.memory_space<smem>>
    %c5_60 = arith.constant 5 : index
    %c3_61 = arith.constant 3 : index
    %33 = memref.load %arg1[%c5_60, %c3_61] : memref<8x6xf32, #tpu.memory_space<smem>>
    %c5_62 = arith.constant 5 : index
    %c4_63 = arith.constant 4 : index
    %34 = memref.load %arg1[%c5_62, %c4_63] : memref<8x6xf32, #tpu.memory_space<smem>>
    %c5_64 = arith.constant 5 : index
    %c5_65 = arith.constant 5 : index
    %35 = memref.load %arg1[%c5_64, %c5_65] : memref<8x6xf32, #tpu.memory_space<smem>>
    %c6 = arith.constant 6 : index
    %c0_66 = arith.constant 0 : index
    %36 = memref.load %arg1[%c6, %c0_66] : memref<8x6xf32, #tpu.memory_space<smem>>
    %c6_67 = arith.constant 6 : index
    %c1_68 = arith.constant 1 : index
    %37 = memref.load %arg1[%c6_67, %c1_68] : memref<8x6xf32, #tpu.memory_space<smem>>
    %c6_69 = arith.constant 6 : index
    %c2_70 = arith.constant 2 : index
    %38 = memref.load %arg1[%c6_69, %c2_70] : memref<8x6xf32, #tpu.memory_space<smem>>
    %c6_71 = arith.constant 6 : index
    %c3_72 = arith.constant 3 : index
    %39 = memref.load %arg1[%c6_71, %c3_72] : memref<8x6xf32, #tpu.memory_space<smem>>
    %c6_73 = arith.constant 6 : index
    %c4_74 = arith.constant 4 : index
    %40 = memref.load %arg1[%c6_73, %c4_74] : memref<8x6xf32, #tpu.memory_space<smem>>
    %c6_75 = arith.constant 6 : index
    %c5_76 = arith.constant 5 : index
    %41 = memref.load %arg1[%c6_75, %c5_76] : memref<8x6xf32, #tpu.memory_space<smem>>
    %c7 = arith.constant 7 : index
    %c0_77 = arith.constant 0 : index
    %42 = memref.load %arg1[%c7, %c0_77] : memref<8x6xf32, #tpu.memory_space<smem>>
    %c7_78 = arith.constant 7 : index
    %c1_79 = arith.constant 1 : index
    %43 = memref.load %arg1[%c7_78, %c1_79] : memref<8x6xf32, #tpu.memory_space<smem>>
    %c7_80 = arith.constant 7 : index
    %c2_81 = arith.constant 2 : index
    %44 = memref.load %arg1[%c7_80, %c2_81] : memref<8x6xf32, #tpu.memory_space<smem>>
    %c7_82 = arith.constant 7 : index
    %c3_83 = arith.constant 3 : index
    %45 = memref.load %arg1[%c7_82, %c3_83] : memref<8x6xf32, #tpu.memory_space<smem>>
    %c7_84 = arith.constant 7 : index
    %c4_85 = arith.constant 4 : index
    %46 = memref.load %arg1[%c7_84, %c4_85] : memref<8x6xf32, #tpu.memory_space<smem>>
    %c7_86 = arith.constant 7 : index
    %c5_87 = arith.constant 5 : index
    %47 = memref.load %arg1[%c7_86, %c5_87] : memref<8x6xf32, #tpu.memory_space<smem>>
    %c0_88 = arith.constant 0 : index
    %48 = memref.load %arg2[%c0_88] : memref<6xf32, #tpu.memory_space<smem>>
    %c1_89 = arith.constant 1 : index
    %49 = memref.load %arg2[%c1_89] : memref<6xf32, #tpu.memory_space<smem>>
    %c2_90 = arith.constant 2 : index
    %50 = memref.load %arg2[%c2_90] : memref<6xf32, #tpu.memory_space<smem>>
    %c3_91 = arith.constant 3 : index
    %51 = memref.load %arg2[%c3_91] : memref<6xf32, #tpu.memory_space<smem>>
    %c4_92 = arith.constant 4 : index
    %52 = memref.load %arg2[%c4_92] : memref<6xf32, #tpu.memory_space<smem>>
    %c5_93 = arith.constant 5 : index
    %53 = memref.load %arg2[%c5_93] : memref<6xf32, #tpu.memory_space<smem>>
    %c0_94 = arith.constant 0 : index
    %c0_95 = arith.constant 0 : index
    %54 = memref.load %arg3[%c0_94, %c0_95] : memref<6x4xf32, #tpu.memory_space<smem>>
    %c0_96 = arith.constant 0 : index
    %c1_97 = arith.constant 1 : index
    %55 = memref.load %arg3[%c0_96, %c1_97] : memref<6x4xf32, #tpu.memory_space<smem>>
    %c0_98 = arith.constant 0 : index
    %c2_99 = arith.constant 2 : index
    %56 = memref.load %arg3[%c0_98, %c2_99] : memref<6x4xf32, #tpu.memory_space<smem>>
    %c0_100 = arith.constant 0 : index
    %c3_101 = arith.constant 3 : index
    %57 = memref.load %arg3[%c0_100, %c3_101] : memref<6x4xf32, #tpu.memory_space<smem>>
    %c1_102 = arith.constant 1 : index
    %c0_103 = arith.constant 0 : index
    %58 = memref.load %arg3[%c1_102, %c0_103] : memref<6x4xf32, #tpu.memory_space<smem>>
    %c1_104 = arith.constant 1 : index
    %c1_105 = arith.constant 1 : index
    %59 = memref.load %arg3[%c1_104, %c1_105] : memref<6x4xf32, #tpu.memory_space<smem>>
    %c1_106 = arith.constant 1 : index
    %c2_107 = arith.constant 2 : index
    %60 = memref.load %arg3[%c1_106, %c2_107] : memref<6x4xf32, #tpu.memory_space<smem>>
    %c1_108 = arith.constant 1 : index
    %c3_109 = arith.constant 3 : index
    %61 = memref.load %arg3[%c1_108, %c3_109] : memref<6x4xf32, #tpu.memory_space<smem>>
    %c2_110 = arith.constant 2 : index
    %c0_111 = arith.constant 0 : index
    %62 = memref.load %arg3[%c2_110, %c0_111] : memref<6x4xf32, #tpu.memory_space<smem>>
    %c2_112 = arith.constant 2 : index
    %c1_113 = arith.constant 1 : index
    %63 = memref.load %arg3[%c2_112, %c1_113] : memref<6x4xf32, #tpu.memory_space<smem>>
    %c2_114 = arith.constant 2 : index
    %c2_115 = arith.constant 2 : index
    %64 = memref.load %arg3[%c2_114, %c2_115] : memref<6x4xf32, #tpu.memory_space<smem>>
    %c2_116 = arith.constant 2 : index
    %c3_117 = arith.constant 3 : index
    %65 = memref.load %arg3[%c2_116, %c3_117] : memref<6x4xf32, #tpu.memory_space<smem>>
    %c3_118 = arith.constant 3 : index
    %c0_119 = arith.constant 0 : index
    %66 = memref.load %arg3[%c3_118, %c0_119] : memref<6x4xf32, #tpu.memory_space<smem>>
    %c3_120 = arith.constant 3 : index
    %c1_121 = arith.constant 1 : index
    %67 = memref.load %arg3[%c3_120, %c1_121] : memref<6x4xf32, #tpu.memory_space<smem>>
    %c3_122 = arith.constant 3 : index
    %c2_123 = arith.constant 2 : index
    %68 = memref.load %arg3[%c3_122, %c2_123] : memref<6x4xf32, #tpu.memory_space<smem>>
    %c3_124 = arith.constant 3 : index
    %c3_125 = arith.constant 3 : index
    %69 = memref.load %arg3[%c3_124, %c3_125] : memref<6x4xf32, #tpu.memory_space<smem>>
    %c4_126 = arith.constant 4 : index
    %c0_127 = arith.constant 0 : index
    %70 = memref.load %arg3[%c4_126, %c0_127] : memref<6x4xf32, #tpu.memory_space<smem>>
    %c4_128 = arith.constant 4 : index
    %c1_129 = arith.constant 1 : index
    %71 = memref.load %arg3[%c4_128, %c1_129] : memref<6x4xf32, #tpu.memory_space<smem>>
    %c4_130 = arith.constant 4 : index
    %c2_131 = arith.constant 2 : index
    %72 = memref.load %arg3[%c4_130, %c2_131] : memref<6x4xf32, #tpu.memory_space<smem>>
    %c4_132 = arith.constant 4 : index
    %c3_133 = arith.constant 3 : index
    %73 = memref.load %arg3[%c4_132, %c3_133] : memref<6x4xf32, #tpu.memory_space<smem>>
    %c5_134 = arith.constant 5 : index
    %c0_135 = arith.constant 0 : index
    %74 = memref.load %arg3[%c5_134, %c0_135] : memref<6x4xf32, #tpu.memory_space<smem>>
    %c5_136 = arith.constant 5 : index
    %c1_137 = arith.constant 1 : index
    %75 = memref.load %arg3[%c5_136, %c1_137] : memref<6x4xf32, #tpu.memory_space<smem>>
    %c5_138 = arith.constant 5 : index
    %c2_139 = arith.constant 2 : index
    %76 = memref.load %arg3[%c5_138, %c2_139] : memref<6x4xf32, #tpu.memory_space<smem>>
    %c5_140 = arith.constant 5 : index
    %c3_141 = arith.constant 3 : index
    %77 = memref.load %arg3[%c5_140, %c3_141] : memref<6x4xf32, #tpu.memory_space<smem>>
    %c0_142 = arith.constant 0 : index
    %78 = memref.load %arg4[%c0_142] : memref<4xf32, #tpu.memory_space<smem>>
    %c1_143 = arith.constant 1 : index
    %79 = memref.load %arg4[%c1_143] : memref<4xf32, #tpu.memory_space<smem>>
    %c2_144 = arith.constant 2 : index
    %80 = memref.load %arg4[%c2_144] : memref<4xf32, #tpu.memory_space<smem>>
    %c3_145 = arith.constant 3 : index
    %81 = memref.load %arg4[%c3_145] : memref<4xf32, #tpu.memory_space<smem>>
    %c0_146 = arith.constant 0 : index
    %c0_147 = arith.constant 0 : index
    %82 = memref.load %arg5[%c0_146, %c0_147] : memref<4x1xf32, #tpu.memory_space<smem>>
    %c1_148 = arith.constant 1 : index
    %c0_149 = arith.constant 0 : index
    %83 = memref.load %arg5[%c1_148, %c0_149] : memref<4x1xf32, #tpu.memory_space<smem>>
    %c2_150 = arith.constant 2 : index
    %c0_151 = arith.constant 0 : index
    %84 = memref.load %arg5[%c2_150, %c0_151] : memref<4x1xf32, #tpu.memory_space<smem>>
    %c3_152 = arith.constant 3 : index
    %c0_153 = arith.constant 0 : index
    %85 = memref.load %arg5[%c3_152, %c0_153] : memref<4x1xf32, #tpu.memory_space<smem>>
    %c0_154 = arith.constant 0 : index
    %86 = memref.load %arg6[%c0_154] : memref<1xf32, #tpu.memory_space<smem>>
    %c0_i32 = arith.constant 0 : i32
    %c1_i32 = arith.constant 1 : i32
    %87 = arith.muli %c0_i32, %c1_i32 : i32
    %c0_i32_155 = arith.constant 0 : i32
    %88 = arith.addi %c0_i32_155, %87 : i32
    %c128_i32 = arith.constant 128 : i32
    %89 = arith.muli %88, %c128_i32 : i32
    %90 = tpu.assume_multiple %89, 128 : i32
    %c0_156 = arith.constant 0 : index
    %c0_157 = arith.constant 0 : index
    %91 = arith.index_cast %90 : i32 to index
    %92 = vector.load %arg7[%c0_156, %c0_157, %91] : memref<8x8x128xf32, #tpu.memory_space<vmem>>, vector<1x8x128xf32>
    %93 = vector.shape_cast %92 : vector<1x8x128xf32> to vector<8x128xf32>
    %94 = vector.broadcast %0 : f32 to vector<8x128xf32>
    %95 = arith.mulf %93, %94 : vector<8x128xf32>
    %96 = vector.broadcast %1 : f32 to vector<8x128xf32>
    %97 = arith.mulf %93, %96 : vector<8x128xf32>
    %98 = vector.broadcast %2 : f32 to vector<8x128xf32>
    %99 = arith.mulf %93, %98 : vector<8x128xf32>
    %100 = vector.broadcast %3 : f32 to vector<8x128xf32>
    %101 = arith.mulf %93, %100 : vector<8x128xf32>
    %102 = vector.broadcast %4 : f32 to vector<8x128xf32>
    %103 = arith.mulf %93, %102 : vector<8x128xf32>
    %104 = vector.broadcast %5 : f32 to vector<8x128xf32>
    %105 = arith.mulf %93, %104 : vector<8x128xf32>
    %c1_158 = arith.constant 1 : index
    %c0_159 = arith.constant 0 : index
    %106 = arith.index_cast %90 : i32 to index
    %107 = vector.load %arg7[%c1_158, %c0_159, %106] : memref<8x8x128xf32, #tpu.memory_space<vmem>>, vector<1x8x128xf32>
    %108 = vector.shape_cast %107 : vector<1x8x128xf32> to vector<8x128xf32>
    %109 = vector.broadcast %6 : f32 to vector<8x128xf32>
    %110 = arith.mulf %108, %109 : vector<8x128xf32>
    %111 = arith.addf %95, %110 : vector<8x128xf32>
    %112 = vector.broadcast %7 : f32 to vector<8x128xf32>
    %113 = arith.mulf %108, %112 : vector<8x128xf32>
    %114 = arith.addf %97, %113 : vector<8x128xf32>
    %115 = vector.broadcast %8 : f32 to vector<8x128xf32>
    %116 = arith.mulf %108, %115 : vector<8x128xf32>
    %117 = arith.addf %99, %116 : vector<8x128xf32>
    %118 = vector.broadcast %9 : f32 to vector<8x128xf32>
    %119 = arith.mulf %108, %118 : vector<8x128xf32>
    %120 = arith.addf %101, %119 : vector<8x128xf32>
    %121 = vector.broadcast %10 : f32 to vector<8x128xf32>
    %122 = arith.mulf %108, %121 : vector<8x128xf32>
    %123 = arith.addf %103, %122 : vector<8x128xf32>
    %124 = vector.broadcast %11 : f32 to vector<8x128xf32>
    %125 = arith.mulf %108, %124 : vector<8x128xf32>
    %126 = arith.addf %105, %125 : vector<8x128xf32>
    %c2_160 = arith.constant 2 : index
    %c0_161 = arith.constant 0 : index
    %127 = arith.index_cast %90 : i32 to index
    %128 = vector.load %arg7[%c2_160, %c0_161, %127] : memref<8x8x128xf32, #tpu.memory_space<vmem>>, vector<1x8x128xf32>
    %129 = vector.shape_cast %128 : vector<1x8x128xf32> to vector<8x128xf32>
    %130 = vector.broadcast %12 : f32 to vector<8x128xf32>
    %131 = arith.mulf %129, %130 : vector<8x128xf32>
    %132 = arith.addf %111, %131 : vector<8x128xf32>
    %133 = vector.broadcast %13 : f32 to vector<8x128xf32>
    %134 = arith.mulf %129, %133 : vector<8x128xf32>
    %135 = arith.addf %114, %134 : vector<8x128xf32>
    %136 = vector.broadcast %14 : f32 to vector<8x128xf32>
    %137 = arith.mulf %129, %136 : vector<8x128xf32>
    %138 = arith.addf %117, %137 : vector<8x128xf32>
    %139 = vector.broadcast %15 : f32 to vector<8x128xf32>
    %140 = arith.mulf %129, %139 : vector<8x128xf32>
    %141 = arith.addf %120, %140 : vector<8x128xf32>
    %142 = vector.broadcast %16 : f32 to vector<8x128xf32>
    %143 = arith.mulf %129, %142 : vector<8x128xf32>
    %144 = arith.addf %123, %143 : vector<8x128xf32>
    %145 = vector.broadcast %17 : f32 to vector<8x128xf32>
    %146 = arith.mulf %129, %145 : vector<8x128xf32>
    %147 = arith.addf %126, %146 : vector<8x128xf32>
    %c3_162 = arith.constant 3 : index
    %c0_163 = arith.constant 0 : index
    %148 = arith.index_cast %90 : i32 to index
    %149 = vector.load %arg7[%c3_162, %c0_163, %148] : memref<8x8x128xf32, #tpu.memory_space<vmem>>, vector<1x8x128xf32>
    %150 = vector.shape_cast %149 : vector<1x8x128xf32> to vector<8x128xf32>
    %151 = vector.broadcast %18 : f32 to vector<8x128xf32>
    %152 = arith.mulf %150, %151 : vector<8x128xf32>
    %153 = arith.addf %132, %152 : vector<8x128xf32>
    %154 = vector.broadcast %19 : f32 to vector<8x128xf32>
    %155 = arith.mulf %150, %154 : vector<8x128xf32>
    %156 = arith.addf %135, %155 : vector<8x128xf32>
    %157 = vector.broadcast %20 : f32 to vector<8x128xf32>
    %158 = arith.mulf %150, %157 : vector<8x128xf32>
    %159 = arith.addf %138, %158 : vector<8x128xf32>
    %160 = vector.broadcast %21 : f32 to vector<8x128xf32>
    %161 = arith.mulf %150, %160 : vector<8x128xf32>
    %162 = arith.addf %141, %161 : vector<8x128xf32>
    %163 = vector.broadcast %22 : f32 to vector<8x128xf32>
    %164 = arith.mulf %150, %163 : vector<8x128xf32>
    %165 = arith.addf %144, %164 : vector<8x128xf32>
    %166 = vector.broadcast %23 : f32 to vector<8x128xf32>
    %167 = arith.mulf %150, %166 : vector<8x128xf32>
    %168 = arith.addf %147, %167 : vector<8x128xf32>
    %c4_164 = arith.constant 4 : index
    %c0_165 = arith.constant 0 : index
    %169 = arith.index_cast %90 : i32 to index
    %170 = vector.load %arg7[%c4_164, %c0_165, %169] : memref<8x8x128xf32, #tpu.memory_space<vmem>>, vector<1x8x128xf32>
    %171 = vector.shape_cast %170 : vector<1x8x128xf32> to vector<8x128xf32>
    %172 = vector.broadcast %24 : f32 to vector<8x128xf32>
    %173 = arith.mulf %171, %172 : vector<8x128xf32>
    %174 = arith.addf %153, %173 : vector<8x128xf32>
    %175 = vector.broadcast %25 : f32 to vector<8x128xf32>
    %176 = arith.mulf %171, %175 : vector<8x128xf32>
    %177 = arith.addf %156, %176 : vector<8x128xf32>
    %178 = vector.broadcast %26 : f32 to vector<8x128xf32>
    %179 = arith.mulf %171, %178 : vector<8x128xf32>
    %180 = arith.addf %159, %179 : vector<8x128xf32>
    %181 = vector.broadcast %27 : f32 to vector<8x128xf32>
    %182 = arith.mulf %171, %181 : vector<8x128xf32>
    %183 = arith.addf %162, %182 : vector<8x128xf32>
    %184 = vector.broadcast %28 : f32 to vector<8x128xf32>
    %185 = arith.mulf %171, %184 : vector<8x128xf32>
    %186 = arith.addf %165, %185 : vector<8x128xf32>
    %187 = vector.broadcast %29 : f32 to vector<8x128xf32>
    %188 = arith.mulf %171, %187 : vector<8x128xf32>
    %189 = arith.addf %168, %188 : vector<8x128xf32>
    %c5_166 = arith.constant 5 : index
    %c0_167 = arith.constant 0 : index
    %190 = arith.index_cast %90 : i32 to index
    %191 = vector.load %arg7[%c5_166, %c0_167, %190] : memref<8x8x128xf32, #tpu.memory_space<vmem>>, vector<1x8x128xf32>
    %192 = vector.shape_cast %191 : vector<1x8x128xf32> to vector<8x128xf32>
    %193 = vector.broadcast %30 : f32 to vector<8x128xf32>
    %194 = arith.mulf %192, %193 : vector<8x128xf32>
    %195 = arith.addf %174, %194 : vector<8x128xf32>
    %196 = vector.broadcast %31 : f32 to vector<8x128xf32>
    %197 = arith.mulf %192, %196 : vector<8x128xf32>
    %198 = arith.addf %177, %197 : vector<8x128xf32>
    %199 = vector.broadcast %32 : f32 to vector<8x128xf32>
    %200 = arith.mulf %192, %199 : vector<8x128xf32>
    %201 = arith.addf %180, %200 : vector<8x128xf32>
    %202 = vector.broadcast %33 : f32 to vector<8x128xf32>
    %203 = arith.mulf %192, %202 : vector<8x128xf32>
    %204 = arith.addf %183, %203 : vector<8x128xf32>
    %205 = vector.broadcast %34 : f32 to vector<8x128xf32>
    %206 = arith.mulf %192, %205 : vector<8x128xf32>
    %207 = arith.addf %186, %206 : vector<8x128xf32>
    %208 = vector.broadcast %35 : f32 to vector<8x128xf32>
    %209 = arith.mulf %192, %208 : vector<8x128xf32>
    %210 = arith.addf %189, %209 : vector<8x128xf32>
    %c6_168 = arith.constant 6 : index
    %c0_169 = arith.constant 0 : index
    %211 = arith.index_cast %90 : i32 to index
    %212 = vector.load %arg7[%c6_168, %c0_169, %211] : memref<8x8x128xf32, #tpu.memory_space<vmem>>, vector<1x8x128xf32>
    %213 = vector.shape_cast %212 : vector<1x8x128xf32> to vector<8x128xf32>
    %214 = vector.broadcast %36 : f32 to vector<8x128xf32>
    %215 = arith.mulf %213, %214 : vector<8x128xf32>
    %216 = arith.addf %195, %215 : vector<8x128xf32>
    %217 = vector.broadcast %37 : f32 to vector<8x128xf32>
    %218 = arith.mulf %213, %217 : vector<8x128xf32>
    %219 = arith.addf %198, %218 : vector<8x128xf32>
    %220 = vector.broadcast %38 : f32 to vector<8x128xf32>
    %221 = arith.mulf %213, %220 : vector<8x128xf32>
    %222 = arith.addf %201, %221 : vector<8x128xf32>
    %223 = vector.broadcast %39 : f32 to vector<8x128xf32>
    %224 = arith.mulf %213, %223 : vector<8x128xf32>
    %225 = arith.addf %204, %224 : vector<8x128xf32>
    %226 = vector.broadcast %40 : f32 to vector<8x128xf32>
    %227 = arith.mulf %213, %226 : vector<8x128xf32>
    %228 = arith.addf %207, %227 : vector<8x128xf32>
    %229 = vector.broadcast %41 : f32 to vector<8x128xf32>
    %230 = arith.mulf %213, %229 : vector<8x128xf32>
    %231 = arith.addf %210, %230 : vector<8x128xf32>
    %c7_170 = arith.constant 7 : index
    %c0_171 = arith.constant 0 : index
    %232 = arith.index_cast %90 : i32 to index
    %233 = vector.load %arg7[%c7_170, %c0_171, %232] : memref<8x8x128xf32, #tpu.memory_space<vmem>>, vector<1x8x128xf32>
    %234 = vector.shape_cast %233 : vector<1x8x128xf32> to vector<8x128xf32>
    %235 = vector.broadcast %42 : f32 to vector<8x128xf32>
    %236 = arith.mulf %234, %235 : vector<8x128xf32>
    %237 = arith.addf %216, %236 : vector<8x128xf32>
    %238 = vector.broadcast %43 : f32 to vector<8x128xf32>
    %239 = arith.mulf %234, %238 : vector<8x128xf32>
    %240 = arith.addf %219, %239 : vector<8x128xf32>
    %241 = vector.broadcast %44 : f32 to vector<8x128xf32>
    %242 = arith.mulf %234, %241 : vector<8x128xf32>
    %243 = arith.addf %222, %242 : vector<8x128xf32>
    %244 = vector.broadcast %45 : f32 to vector<8x128xf32>
    %245 = arith.mulf %234, %244 : vector<8x128xf32>
    %246 = arith.addf %225, %245 : vector<8x128xf32>
    %247 = vector.broadcast %46 : f32 to vector<8x128xf32>
    %248 = arith.mulf %234, %247 : vector<8x128xf32>
    %249 = arith.addf %228, %248 : vector<8x128xf32>
    %250 = vector.broadcast %47 : f32 to vector<8x128xf32>
    %251 = arith.mulf %234, %250 : vector<8x128xf32>
    %252 = arith.addf %231, %251 : vector<8x128xf32>
    %253 = vector.broadcast %48 : f32 to vector<8x128xf32>
    %254 = arith.addf %237, %253 : vector<8x128xf32>
    %cst = arith.constant 5.000000e-01 : f32
    %255 = vector.broadcast %cst : f32 to vector<8x128xf32>
    %256 = arith.mulf %255, %254 : vector<8x128xf32>
    %257 = math.tanh %256 : vector<8x128xf32>
    %cst_172 = arith.constant 5.000000e-01 : f32
    %258 = vector.broadcast %cst_172 : f32 to vector<8x128xf32>
    %259 = arith.mulf %258, %257 : vector<8x128xf32>
    %cst_173 = arith.constant 5.000000e-01 : f32
    %260 = vector.broadcast %cst_173 : f32 to vector<8x128xf32>
    %261 = arith.addf %259, %260 : vector<8x128xf32>
    %262 = vector.broadcast %49 : f32 to vector<8x128xf32>
    %263 = arith.addf %240, %262 : vector<8x128xf32>
    %cst_174 = arith.constant 5.000000e-01 : f32
    %264 = vector.broadcast %cst_174 : f32 to vector<8x128xf32>
    %265 = arith.mulf %264, %263 : vector<8x128xf32>
    %266 = math.tanh %265 : vector<8x128xf32>
    %cst_175 = arith.constant 5.000000e-01 : f32
    %267 = vector.broadcast %cst_175 : f32 to vector<8x128xf32>
    %268 = arith.mulf %267, %266 : vector<8x128xf32>
    %cst_176 = arith.constant 5.000000e-01 : f32
    %269 = vector.broadcast %cst_176 : f32 to vector<8x128xf32>
    %270 = arith.addf %268, %269 : vector<8x128xf32>
    %271 = vector.broadcast %50 : f32 to vector<8x128xf32>
    %272 = arith.addf %243, %271 : vector<8x128xf32>
    %cst_177 = arith.constant 5.000000e-01 : f32
    %273 = vector.broadcast %cst_177 : f32 to vector<8x128xf32>
    %274 = arith.mulf %273, %272 : vector<8x128xf32>
    %275 = math.tanh %274 : vector<8x128xf32>
    %cst_178 = arith.constant 5.000000e-01 : f32
    %276 = vector.broadcast %cst_178 : f32 to vector<8x128xf32>
    %277 = arith.mulf %276, %275 : vector<8x128xf32>
    %cst_179 = arith.constant 5.000000e-01 : f32
    %278 = vector.broadcast %cst_179 : f32 to vector<8x128xf32>
    %279 = arith.addf %277, %278 : vector<8x128xf32>
    %280 = vector.broadcast %51 : f32 to vector<8x128xf32>
    %281 = arith.addf %246, %280 : vector<8x128xf32>
    %cst_180 = arith.constant 5.000000e-01 : f32
    %282 = vector.broadcast %cst_180 : f32 to vector<8x128xf32>
    %283 = arith.mulf %282, %281 : vector<8x128xf32>
    %284 = math.tanh %283 : vector<8x128xf32>
    %cst_181 = arith.constant 5.000000e-01 : f32
    %285 = vector.broadcast %cst_181 : f32 to vector<8x128xf32>
    %286 = arith.mulf %285, %284 : vector<8x128xf32>
    %cst_182 = arith.constant 5.000000e-01 : f32
    %287 = vector.broadcast %cst_182 : f32 to vector<8x128xf32>
    %288 = arith.addf %286, %287 : vector<8x128xf32>
    %289 = vector.broadcast %52 : f32 to vector<8x128xf32>
    %290 = arith.addf %249, %289 : vector<8x128xf32>
    %cst_183 = arith.constant 5.000000e-01 : f32
    %291 = vector.broadcast %cst_183 : f32 to vector<8x128xf32>
    %292 = arith.mulf %291, %290 : vector<8x128xf32>
    %293 = math.tanh %292 : vector<8x128xf32>
    %cst_184 = arith.constant 5.000000e-01 : f32
    %294 = vector.broadcast %cst_184 : f32 to vector<8x128xf32>
    %295 = arith.mulf %294, %293 : vector<8x128xf32>
    %cst_185 = arith.constant 5.000000e-01 : f32
    %296 = vector.broadcast %cst_185 : f32 to vector<8x128xf32>
    %297 = arith.addf %295, %296 : vector<8x128xf32>
    %298 = vector.broadcast %53 : f32 to vector<8x128xf32>
    %299 = arith.addf %252, %298 : vector<8x128xf32>
    %cst_186 = arith.constant 5.000000e-01 : f32
    %300 = vector.broadcast %cst_186 : f32 to vector<8x128xf32>
    %301 = arith.mulf %300, %299 : vector<8x128xf32>
    %302 = math.tanh %301 : vector<8x128xf32>
    %cst_187 = arith.constant 5.000000e-01 : f32
    %303 = vector.broadcast %cst_187 : f32 to vector<8x128xf32>
    %304 = arith.mulf %303, %302 : vector<8x128xf32>
    %cst_188 = arith.constant 5.000000e-01 : f32
    %305 = vector.broadcast %cst_188 : f32 to vector<8x128xf32>
    %306 = arith.addf %304, %305 : vector<8x128xf32>
    %307 = vector.broadcast %54 : f32 to vector<8x128xf32>
    %308 = arith.mulf %261, %307 : vector<8x128xf32>
    %309 = vector.broadcast %58 : f32 to vector<8x128xf32>
    %310 = arith.mulf %270, %309 : vector<8x128xf32>
    %311 = arith.addf %308, %310 : vector<8x128xf32>
    %312 = vector.broadcast %62 : f32 to vector<8x128xf32>
    %313 = arith.mulf %279, %312 : vector<8x128xf32>
    %314 = arith.addf %311, %313 : vector<8x128xf32>
    %315 = vector.broadcast %66 : f32 to vector<8x128xf32>
    %316 = arith.mulf %288, %315 : vector<8x128xf32>
    %317 = arith.addf %314, %316 : vector<8x128xf32>
    %318 = vector.broadcast %70 : f32 to vector<8x128xf32>
    %319 = arith.mulf %297, %318 : vector<8x128xf32>
    %320 = arith.addf %317, %319 : vector<8x128xf32>
    %321 = vector.broadcast %74 : f32 to vector<8x128xf32>
    %322 = arith.mulf %306, %321 : vector<8x128xf32>
    %323 = arith.addf %320, %322 : vector<8x128xf32>
    %324 = vector.broadcast %78 : f32 to vector<8x128xf32>
    %325 = arith.addf %323, %324 : vector<8x128xf32>
    %cst_189 = arith.constant 5.000000e-01 : f32
    %326 = vector.broadcast %cst_189 : f32 to vector<8x128xf32>
    %327 = arith.mulf %326, %325 : vector<8x128xf32>
    %328 = math.tanh %327 : vector<8x128xf32>
    %cst_190 = arith.constant 5.000000e-01 : f32
    %329 = vector.broadcast %cst_190 : f32 to vector<8x128xf32>
    %330 = arith.mulf %329, %328 : vector<8x128xf32>
    %cst_191 = arith.constant 5.000000e-01 : f32
    %331 = vector.broadcast %cst_191 : f32 to vector<8x128xf32>
    %332 = arith.addf %330, %331 : vector<8x128xf32>
    %333 = vector.broadcast %55 : f32 to vector<8x128xf32>
    %334 = arith.mulf %261, %333 : vector<8x128xf32>
    %335 = vector.broadcast %59 : f32 to vector<8x128xf32>
    %336 = arith.mulf %270, %335 : vector<8x128xf32>
    %337 = arith.addf %334, %336 : vector<8x128xf32>
    %338 = vector.broadcast %63 : f32 to vector<8x128xf32>
    %339 = arith.mulf %279, %338 : vector<8x128xf32>
    %340 = arith.addf %337, %339 : vector<8x128xf32>
    %341 = vector.broadcast %67 : f32 to vector<8x128xf32>
    %342 = arith.mulf %288, %341 : vector<8x128xf32>
    %343 = arith.addf %340, %342 : vector<8x128xf32>
    %344 = vector.broadcast %71 : f32 to vector<8x128xf32>
    %345 = arith.mulf %297, %344 : vector<8x128xf32>
    %346 = arith.addf %343, %345 : vector<8x128xf32>
    %347 = vector.broadcast %75 : f32 to vector<8x128xf32>
    %348 = arith.mulf %306, %347 : vector<8x128xf32>
    %349 = arith.addf %346, %348 : vector<8x128xf32>
    %350 = vector.broadcast %79 : f32 to vector<8x128xf32>
    %351 = arith.addf %349, %350 : vector<8x128xf32>
    %cst_192 = arith.constant 5.000000e-01 : f32
    %352 = vector.broadcast %cst_192 : f32 to vector<8x128xf32>
    %353 = arith.mulf %352, %351 : vector<8x128xf32>
    %354 = math.tanh %353 : vector<8x128xf32>
    %cst_193 = arith.constant 5.000000e-01 : f32
    %355 = vector.broadcast %cst_193 : f32 to vector<8x128xf32>
    %356 = arith.mulf %355, %354 : vector<8x128xf32>
    %cst_194 = arith.constant 5.000000e-01 : f32
    %357 = vector.broadcast %cst_194 : f32 to vector<8x128xf32>
    %358 = arith.addf %356, %357 : vector<8x128xf32>
    %359 = vector.broadcast %56 : f32 to vector<8x128xf32>
    %360 = arith.mulf %261, %359 : vector<8x128xf32>
    %361 = vector.broadcast %60 : f32 to vector<8x128xf32>
    %362 = arith.mulf %270, %361 : vector<8x128xf32>
    %363 = arith.addf %360, %362 : vector<8x128xf32>
    %364 = vector.broadcast %64 : f32 to vector<8x128xf32>
    %365 = arith.mulf %279, %364 : vector<8x128xf32>
    %366 = arith.addf %363, %365 : vector<8x128xf32>
    %367 = vector.broadcast %68 : f32 to vector<8x128xf32>
    %368 = arith.mulf %288, %367 : vector<8x128xf32>
    %369 = arith.addf %366, %368 : vector<8x128xf32>
    %370 = vector.broadcast %72 : f32 to vector<8x128xf32>
    %371 = arith.mulf %297, %370 : vector<8x128xf32>
    %372 = arith.addf %369, %371 : vector<8x128xf32>
    %373 = vector.broadcast %76 : f32 to vector<8x128xf32>
    %374 = arith.mulf %306, %373 : vector<8x128xf32>
    %375 = arith.addf %372, %374 : vector<8x128xf32>
    %376 = vector.broadcast %80 : f32 to vector<8x128xf32>
    %377 = arith.addf %375, %376 : vector<8x128xf32>
    %cst_195 = arith.constant 5.000000e-01 : f32
    %378 = vector.broadcast %cst_195 : f32 to vector<8x128xf32>
    %379 = arith.mulf %378, %377 : vector<8x128xf32>
    %380 = math.tanh %379 : vector<8x128xf32>
    %cst_196 = arith.constant 5.000000e-01 : f32
    %381 = vector.broadcast %cst_196 : f32 to vector<8x128xf32>
    %382 = arith.mulf %381, %380 : vector<8x128xf32>
    %cst_197 = arith.constant 5.000000e-01 : f32
    %383 = vector.broadcast %cst_197 : f32 to vector<8x128xf32>
    %384 = arith.addf %382, %383 : vector<8x128xf32>
    %385 = vector.broadcast %57 : f32 to vector<8x128xf32>
    %386 = arith.mulf %261, %385 : vector<8x128xf32>
    %387 = vector.broadcast %61 : f32 to vector<8x128xf32>
    %388 = arith.mulf %270, %387 : vector<8x128xf32>
    %389 = arith.addf %386, %388 : vector<8x128xf32>
    %390 = vector.broadcast %65 : f32 to vector<8x128xf32>
    %391 = arith.mulf %279, %390 : vector<8x128xf32>
    %392 = arith.addf %389, %391 : vector<8x128xf32>
    %393 = vector.broadcast %69 : f32 to vector<8x128xf32>
    %394 = arith.mulf %288, %393 : vector<8x128xf32>
    %395 = arith.addf %392, %394 : vector<8x128xf32>
    %396 = vector.broadcast %73 : f32 to vector<8x128xf32>
    %397 = arith.mulf %297, %396 : vector<8x128xf32>
    %398 = arith.addf %395, %397 : vector<8x128xf32>
    %399 = vector.broadcast %77 : f32 to vector<8x128xf32>
    %400 = arith.mulf %306, %399 : vector<8x128xf32>
    %401 = arith.addf %398, %400 : vector<8x128xf32>
    %402 = vector.broadcast %81 : f32 to vector<8x128xf32>
    %403 = arith.addf %401, %402 : vector<8x128xf32>
    %cst_198 = arith.constant 5.000000e-01 : f32
    %404 = vector.broadcast %cst_198 : f32 to vector<8x128xf32>
    %405 = arith.mulf %404, %403 : vector<8x128xf32>
    %406 = math.tanh %405 : vector<8x128xf32>
    %cst_199 = arith.constant 5.000000e-01 : f32
    %407 = vector.broadcast %cst_199 : f32 to vector<8x128xf32>
    %408 = arith.mulf %407, %406 : vector<8x128xf32>
    %cst_200 = arith.constant 5.000000e-01 : f32
    %409 = vector.broadcast %cst_200 : f32 to vector<8x128xf32>
    %410 = arith.addf %408, %409 : vector<8x128xf32>
    %411 = vector.broadcast %82 : f32 to vector<8x128xf32>
    %412 = arith.mulf %332, %411 : vector<8x128xf32>
    %413 = vector.broadcast %83 : f32 to vector<8x128xf32>
    %414 = arith.mulf %358, %413 : vector<8x128xf32>
    %415 = arith.addf %412, %414 : vector<8x128xf32>
    %416 = vector.broadcast %84 : f32 to vector<8x128xf32>
    %417 = arith.mulf %384, %416 : vector<8x128xf32>
    %418 = arith.addf %415, %417 : vector<8x128xf32>
    %419 = vector.broadcast %85 : f32 to vector<8x128xf32>
    %420 = arith.mulf %410, %419 : vector<8x128xf32>
    %421 = arith.addf %418, %420 : vector<8x128xf32>
    %422 = vector.broadcast %86 : f32 to vector<8x128xf32>
    %423 = arith.addf %421, %422 : vector<8x128xf32>
    %cst_201 = arith.constant 5.000000e-01 : f32
    %424 = vector.broadcast %cst_201 : f32 to vector<8x128xf32>
    %425 = arith.mulf %424, %423 : vector<8x128xf32>
    %426 = math.tanh %425 : vector<8x128xf32>
    %cst_202 = arith.constant 5.000000e-01 : f32
    %427 = vector.broadcast %cst_202 : f32 to vector<8x128xf32>
    %428 = arith.mulf %427, %426 : vector<8x128xf32>
    %cst_203 = arith.constant 5.000000e-01 : f32
    %429 = vector.broadcast %cst_203 : f32 to vector<8x128xf32>
    %430 = arith.addf %428, %429 : vector<8x128xf32>
    %c0_204 = arith.constant 0 : index
    %431 = arith.index_cast %90 : i32 to index
    %432 = vector.load %arg8[%c0_204, %431] : memref<8x128xf32, #tpu.memory_space<vmem>>, vector<8x128xf32>
    tpu.vector_store %arg8[%c0_204, %431], %430 {strides = array<i32>} : memref<8x128xf32, #tpu.memory_space<vmem>>, vector<8x128xf32>,
    %c1_i32_205 = arith.constant 1 : i32
    return
  }
  func.func @transform_0(%arg0: i32) -> (i32, i32) {
    %c0_i32 = arith.constant 0 : i32
    %c0_i32_0 = arith.constant 0 : i32
    %c0_i32_1 = arith.constant 0 : i32
    return %c0_i32, %c0_i32_0 : i32, i32
  }
  func.func @transform_1(%arg0: i32) -> i32 {
    %c0_i32 = arith.constant 0 : i32
    %c0_i32_0 = arith.constant 0 : i32
    return %c0_i32 : i32
  }
  func.func @transform_2(%arg0: i32) -> (i32, i32) {
    %c0_i32 = arith.constant 0 : i32
    %c0_i32_0 = arith.constant 0 : i32
    %c0_i32_1 = arith.constant 0 : i32
    return %c0_i32, %c0_i32_0 : i32, i32
  }
  func.func @transform_3(%arg0: i32) -> i32 {
    %c0_i32 = arith.constant 0 : i32
    %c0_i32_0 = arith.constant 0 : i32
    return %c0_i32 : i32
  }
  func.func @transform_4(%arg0: i32) -> (i32, i32) {
    %c0_i32 = arith.constant 0 : i32
    %c0_i32_0 = arith.constant 0 : i32
    %c0_i32_1 = arith.constant 0 : i32
    return %c0_i32, %c0_i32_0 : i32, i32
  }
  func.func @transform_5(%arg0: i32) -> i32 {
    %c0_i32 = arith.constant 0 : i32
    %c0_i32_0 = arith.constant 0 : i32
    return %c0_i32 : i32
  }
  func.func @transform_6(%arg0: i32) -> (i32, i32, i32) {
    %c0_i32 = arith.constant 0 : i32
    %c0_i32_0 = arith.constant 0 : i32
    %c0_i32_1 = arith.constant 0 : i32
    return %c0_i32, %arg0, %c0_i32_0 : i32, i32, i32
  }
  func.func @transform_7(%arg0: i32) -> (i32, i32) {
    %c0_i32 = arith.constant 0 : i32
    %c0_i32_0 = arith.constant 0 : i32
    return %arg0, %c0_i32 : i32, i32
  }
}

</mosaic_0001>

<bundles_post_ra>
// kernel: tpu_custom_call.1
= control target key start
LH: loop header
LB: loop body
LE: loop exit
PB: predicated region body
PF: predicated region fallthrough
CT: control target
= control target key end

     0   :  { %13 = vsyncpa [#allocation6], 0  ;;  %s1066_s0 = inlined_call_operand.vmem [shape: f32[8,6], index: 0, kind: input, shape index: {}]   ;;  %s1067_s1 = inlined_call_operand.vmem [shape: f32[6], index: 1, kind: input, shape index: {}]   ;;  %s1068_s2 = inlined_call_operand.vmem [shape: f32[6,4], index: 2, kind: input, shape index: {}]   ;;  %s1069_s3 = inlined_call_operand.vmem [shape: f32[4], index: 3, kind: input, shape index: {}]   ;;  %s1070_s4 = inlined_call_operand.vmem [shape: f32[4,1], index: 4, kind: input, shape index: {}]   ;;  %s1071_s5 = inlined_call_operand.<no memory space> [shape: f32[1], index: 5, kind: input, shape index: {}]   ;;  %s1072_s6 = inlined_call_operand.hbm [shape: f32[8,8,128], index: 6, kind: input, shape index: {}]   ;;  %s1073_s7 = inlined_call_operand.hbm [shape: f32[8,128], index: 7, kind: output, shape index: {}]  }
   0x1   :  { %14 = vsyncpa [#allocation8], 0 }
   0x2   :  { %15 = vsyncpa [#allocation11], 0 }
   0x3   :  { %16 = vsyncpa [#allocation4], 0  ;;  %s32_s26 = sshll.u32 %s1067_s1, 4  ;;  %s33_s26 = int_to_ptr.vmem [resolvable:$true] %s32_s26 }
   0x4   :  { %17 = vsyncpa [#allocation5], 0  ;;  %s50_s29 = sshll.u32 %s1069_s3, 4  ;;  %s753_s30 = smov [#allocation7]   ;;  %s51_s29 = int_to_ptr.vmem [resolvable:$true] %s50_s29 }
   0x5   :  { %35 = dma.vmem_to_smem %s33_s26, 16, %s753_s30, [#allocation8]  }
   0x6   :  { %s754_s8 = smov [#allocation10]   ;;  %s23_s11 = sshll.u32 %s1066_s0, 4  ;;  %s24_s11 = int_to_ptr.vmem [resolvable:$true] %s23_s11 }
   0x7   :  { %53 = dma.vmem_to_smem %s51_s29, 16, %s754_s8, [#allocation11]  }
   0x8   :  { %s41_s1 = sshll.u32 %s1068_s2, 4  ;;  %s755_s14 = smov [#allocation3]   ;;  %s42_s1 = int_to_ptr.vmem [resolvable:$true] %s41_s1 }
   0x9   :  { %26 = dma.vmem_to_smem %s24_s11, 128, %s755_s14, [#allocation6]  }
   0xa   :  { %s756_s15 = smov [#allocation9]   ;;  %s59_s17 = sshll.u32 %s1070_s4, 4  ;;  %s60_s17 = int_to_ptr.vmem [resolvable:$true] %s59_s17 }
   0xb   :  { %44 = dma.vmem_to_smem %s42_s1, 128, %s756_s15, [#allocation8]  }
   0xc   :  { %s69_s20 = sshll.u32 %s1072_s6, 4  ;;  %s757_s0 = smov [#allocation12]   ;;  %s70_s20 = int_to_ptr.hbm [resolvable:$true] %s69_s20 }
   0xd   :  { %62 = dma.vmem_to_smem %s60_s17, 64, %s757_s0, [#allocation11]  }
   0xe   :  { %s758_s21 = smov [#allocation13]   ;;  %s759_s2 = smov 128  }
   0xf   :  { %s71_s22 = sshll.u32 %s758_s21, 4  ;;  %s760_s23 = smov 8   ;;  %s72_s22 = int_to_ptr.vmem [resolvable:$true] %s71_s22 }
  0x10   :  { %77 = dma.hbm_to_vmem [thread:$0]  %s70_s20, 1024, %s72_s22, [#allocation4], %s759_s2, %s759_s2, %s760_s23  }
  0x11   :  { %743 = dma.done.wait [#allocation6], 128  }
  0x12   :  { %744 = vsyncadd [#allocation6], 4294967168 }
  0x13   :  { %745 = dma.done.wait [#allocation8], 144  }
  0x14   :  { %746 = vsyncadd [#allocation8], 4294967152 }
  0x15   :  { %747 = dma.done.wait [#allocation11], 80  }
  0x16   :  { %748 = vsyncadd [#allocation11], 4294967216 }
  0x17   :  { %749 = dma.done.wait [#allocation4], 1024  }
  0x18   :  { %750 = vsyncadd [#allocation4], 4294966272 }
  0x19   :  { %102 = sfence }
  0x1a   :  { %s103_s4 = sld [smem:[#allocation3]]  ;;  %v190_v0 = vld [vmem:[#allocation13] sm:$0xff]  ;;  %v205_v4 = vld [vmem:[#allocation13 + $0x8] sm:$0xff]  ;;  %v226_v22 = vld [vmem:[#allocation13 + $0x10] sm:$0xff] }
  0x1b   :  { %s523_s6 = sld [smem:[#allocation3 + $0x1]]  ;;  %v247_v39 = vld [vmem:[#allocation13 + $0x18] sm:$0xff]  ;;  %v268_v59 = vld [vmem:[#allocation13 + $0x20] sm:$0xff] }
  0x1c   :  { %s820_s24 = sld [smem:[#allocation3 + $0x2]] }
  0x1d   :  { %s822_s25 = sld [smem:[#allocation3 + $0x3]] }
  0x1e   :  { %s824_s26 = sld [smem:[#allocation3 + $0x4]] }
  0x1f   :  { %s826_s27 = sld [smem:[#allocation3 + $0x5]] }
  0x20   :  { %s828_s28 = sld [smem:[#allocation3 + $0x80]]  ;;  %v191_v1 = vstv %s103_s4 }
  0x21   :  { %s830_s29 = sld [smem:[#allocation3 + $0x81]]  ;;  %v193_v2 = vstv %s523_s6  ;;  %v192_v8 = vmul.f32 %v191_v1, %v190_v0 }
  0x22   :  { %s832_s30 = sld [smem:[#allocation3 + $0x82]]  ;;  %v195_v3 = vstv %s820_s24  ;;  %v194_v9 = vmul.f32 %v193_v2, %v190_v0 }
  0x23   :  { %s834_s8 = sld [smem:[#allocation3 + $0x83]]  ;;  %v197_v10 = vstv %s822_s25  ;;  %v196_v12 = vmul.f32 %v195_v3, %v190_v0 }
  0x24   :  { %s836_s9 = sld [smem:[#allocation3 + $0x84]]  ;;  %v199_v13 = vstv %s824_s26  ;;  %v198_v20 = vmul.f32 %v197_v10, %v190_v0 }
  0x25   :  { %s838_s10 = sld [smem:[#allocation3 + $0x85]]  ;;  %v201_v16 = vstv %s826_s27  ;;  %v200_v24 = vmul.f32 %v199_v13, %v190_v0 }
  0x26   :  { %s840_s11 = sld [smem:[#allocation3 + $0x100]]  ;;  %v206_v5 = vstv %s828_s28  ;;  %v202_v28 = vmul.f32 %v201_v16, %v190_v0 }
  0x27   :  { %s842_s12 = sld [smem:[#allocation3 + $0x101]]  ;;  %v209_v6 = vstv %s830_s29  ;;  %v207_v14 = vmul.f32 %v206_v5, %v205_v4 }
  0x28   :  { %s844_s13 = sld [smem:[#allocation3 + $0x102]]  ;;  %v212_v7 = vstv %s832_s30  ;;  %v210_v17 = vmul.f32 %v209_v6, %v205_v4 }
  0x29   :  { %s846_s1 = sld [smem:[#allocation3 + $0x103]]  ;;  %v215_v11 = vstv %s834_s8  ;;  %v213_v18 = vmul.f32 %v212_v7, %v205_v4  ;;  %v208_v29 = vadd.f32 %v207_v14, %v192_v8 }
  0x2a   :  { %s848_s14 = sld [smem:[#allocation3 + $0x104]]  ;;  %v218_v15 = vstv %s836_s9  ;;  %v216_v21 = vmul.f32 %v215_v11, %v205_v4  ;;  %v211_v32 = vadd.f32 %v210_v17, %v194_v9  ;;  %v289_v11 = vld [vmem:[#allocation13 + $0x28] sm:$0xff] }
  0x2b   :  { %s850_s15 = sld [smem:[#allocation3 + $0x105]]  ;;  %v221_v19 = vstv %s838_s10  ;;  %v219_v25 = vmul.f32 %v218_v15, %v205_v4  ;;  %v214_v33 = vadd.f32 %v213_v18, %v196_v12 }
  0x2c   :  { %s852_s3 = sld [smem:[#allocation3 + $0x180]]  ;;  %v227_v23 = vstv %s840_s11  ;;  %v222_v30 = vmul.f32 %v221_v19, %v205_v4  ;;  %v217_v41 = vadd.f32 %v216_v21, %v198_v20 }
  0x2d   :  { %s856_s16 = sld [smem:[#allocation3 + $0x181]]  ;;  %v230_v26 = vstv %s842_s12  ;;  %v228_v34 = vmul.f32 %v227_v23, %v226_v22  ;;  %v220_v42 = vadd.f32 %v219_v25, %v200_v24 }
  0x2e   :  { %s860_s17 = sld [smem:[#allocation3 + $0x182]]  ;;  %v233_v27 = vstv %s844_s13  ;;  %v231_v36 = vmul.f32 %v230_v26, %v226_v22  ;;  %v223_v45 = vadd.f32 %v222_v30, %v202_v28 }
  0x2f   :  { %s864_s18 = sld [smem:[#allocation3 + $0x183]]  ;;  %v236_v31 = vstv %s846_s1  ;;  %v234_v37 = vmul.f32 %v233_v27, %v226_v22  ;;  %v229_v49 = vadd.f32 %v228_v34, %v208_v29  ;;  %v310_v27 = vld [vmem:[#allocation13 + $0x30] sm:$0xff] }
  0x30   :  { %s868_s19 = sld [smem:[#allocation3 + $0x184]]  ;;  %v239_v35 = vstv %s848_s14  ;;  %v237_v43 = vmul.f32 %v236_v31, %v226_v22  ;;  %v232_v53 = vadd.f32 %v231_v36, %v211_v32 }
  0x31   :  { %s872_s20 = sld [smem:[#allocation3 + $0x185]]  ;;  %v242_v38 = vstv %s850_s15  ;;  %v240_v46 = vmul.f32 %v239_v35, %v226_v22  ;;  %v235_v54 = vadd.f32 %v234_v37, %v214_v33 }
  0x32   :  { %s875_s0 = sld [smem:[#allocation3 + $0x200]]  ;;  %v248_v40 = vstv %s852_s3  ;;  %v243_v50 = vmul.f32 %v242_v38, %v226_v22  ;;  %v238_v56 = vadd.f32 %v237_v43, %v217_v41 }
  0x33   :  { %s879_s21 = sld [smem:[#allocation3 + $0x201]]  ;;  %v251_v44 = vstv %s856_s16  ;;  %v249_v51 = vmul.f32 %v248_v40, %v247_v39  ;;  %v241_v61 = vadd.f32 %v240_v46, %v220_v42 }
  0x34   :  { %s882_s22 = sld [smem:[#allocation3 + $0x202]]  ;;  %v254_v47 = vstv %s860_s17  ;;  %v252_v55 = vmul.f32 %v251_v44, %v247_v39  ;;  %v244_v0 = vadd.f32 %v243_v50, %v223_v45  ;;  %v331_v50 = vld [vmem:[#allocation13 + $0x38] sm:$0xff] }
  0x35   :  { %s885_s2 = sld [smem:[#allocation3 + $0x203]]  ;;  %v257_v48 = vstv %s864_s18  ;;  %v255_v57 = vmul.f32 %v254_v47, %v247_v39  ;;  %v250_v1 = vadd.f32 %v249_v51, %v229_v49 }
  0x36   :  { %s889_s23 = sld [smem:[#allocation3 + $0x204]]  ;;  %v260_v52 = vstv %s868_s19  ;;  %v258_v58 = vmul.f32 %v257_v48, %v247_v39  ;;  %v253_v4 = vadd.f32 %v252_v55, %v232_v53 }
  0x37   :  { %s892_s4 = sld [smem:[#allocation3 + $0x205]]  ;;  %v261_v62 = vmul.f32 %v260_v52, %v247_v39  ;;  %v263_v63 = vstv %s872_s20  ;;  %v256_v8 = vadd.f32 %v255_v57, %v235_v54 }
  0x38   :  { %s896_s6 = sld [smem:[#allocation3 + $0x280]]  ;;  %v269_v60 = vstv %s875_s0  ;;  %v259_v9 = vadd.f32 %v258_v58, %v238_v56  ;;  %v264_v10 = vmul.f32 %v263_v63, %v247_v39 }
  0x39   :  { %s899_s24 = sld [smem:[#allocation3 + $0x281]]  ;;  %v272_v2 = vstv %s879_s21  ;;  %v270_v5 = vmul.f32 %v269_v60, %v268_v59  ;;  %v262_v13 = vadd.f32 %v261_v62, %v241_v61 }
  0x3a   :  { %s901_s25 = sld [smem:[#allocation3 + $0x282]]  ;;  %v275_v3 = vstv %s882_s22  ;;  %v273_v14 = vmul.f32 %v272_v2, %v268_v59  ;;  %v265_v23 = vadd.f32 %v264_v10, %v244_v0 }
  0x3b   :  { %s904_s26 = sld [smem:[#allocation3 + $0x283]]  ;;  %v278_v6 = vstv %s885_s2  ;;  %v276_v15 = vmul.f32 %v275_v3, %v268_v59  ;;  %v271_v21 = vadd.f32 %v270_v5, %v250_v1 }
  0x3c   :  { %s907_s27 = sld [smem:[#allocation3 + $0x284]]  ;;  %v281_v7 = vstv %s889_s23  ;;  %v279_v17 = vmul.f32 %v278_v6, %v268_v59  ;;  %v274_v28 = vadd.f32 %v273_v14, %v253_v4 }
  0x3d   :  { %s911_s28 = sld [smem:[#allocation3 + $0x285]]  ;;  %v284_v16 = vstv %s892_s4  ;;  %v282_v18 = vmul.f32 %v281_v7, %v268_v59  ;;  %v277_v29 = vadd.f32 %v276_v15, %v256_v8 }
  0x3e   :  { %s915_s29 = sld [smem:[#allocation3 + $0x300]]  ;;  %v290_v12 = vstv %s896_s6  ;;  %v285_v24 = vmul.f32 %v284_v16, %v268_v59  ;;  %v280_v32 = vadd.f32 %v279_v17, %v259_v9 }
  0x3f   :  { %s918_s30 = sld [smem:[#allocation3 + $0x301]]  ;;  %v293_v19 = vstv %s899_s24  ;;  %v291_v22 = vmul.f32 %v290_v12, %v289_v11  ;;  %v283_v33 = vadd.f32 %v282_v18, %v262_v13 }
  0x40   :  { %s921_s8 = sld [smem:[#allocation3 + $0x302]]  ;;  %v296_v20 = vstv %s901_s25  ;;  %v294_v30 = vmul.f32 %v293_v19, %v289_v11  ;;  %v286_v40 = vadd.f32 %v285_v24, %v265_v23 }
  0x41   :  { %s925_s9 = sld [smem:[#allocation3 + $0x303]]  ;;  %v299_v25 = vstv %s904_s26  ;;  %v297_v31 = vmul.f32 %v296_v20, %v289_v11  ;;  %v292_v36 = vadd.f32 %v291_v22, %v271_v21 }
  0x42   :  { %s927_s10 = sld [smem:[#allocation3 + $0x304]]  ;;  %v302_v26 = vstv %s907_s27  ;;  %v300_v37 = vmul.f32 %v299_v25, %v289_v11  ;;  %v295_v44 = vadd.f32 %v294_v30, %v274_v28 }
  0x43   :  { %s931_s11 = sld [smem:[#allocation3 + $0x305]]  ;;  %v305_v34 = vstv %s911_s28  ;;  %v303_v38 = vmul.f32 %v302_v26, %v289_v11  ;;  %v298_v45 = vadd.f32 %v297_v31, %v277_v29 }
  0x44   :  { %s933_s12 = sld [smem:[#allocation3 + $0x380]]  ;;  %v311_v35 = vstv %s915_s29  ;;  %v306_v41 = vmul.f32 %v305_v34, %v289_v11  ;;  %v301_v51 = vadd.f32 %v300_v37, %v280_v32 }
  0x45   :  { %s937_s13 = sld [smem:[#allocation3 + $0x381]]  ;;  %v312_v39 = vmul.f32 %v311_v35, %v310_v27  ;;  %v314_v42 = vstv %s918_s30  ;;  %v304_v52 = vadd.f32 %v303_v38, %v283_v33 }
  0x46   :  { %s939_s1 = sld [smem:[#allocation3 + $0x382]]  ;;  %v317_v43 = vstv %s921_s8  ;;  %v315_v46 = vmul.f32 %v314_v42, %v310_v27  ;;  %v307_v55 = vadd.f32 %v306_v41, %v286_v40 }
  0x47   :  { %s943_s14 = sld [smem:[#allocation3 + $0x383]]  ;;  %v318_v47 = vmul.f32 %v317_v43, %v310_v27  ;;  %v320_v48 = vstv %s925_s9  ;;  %v313_v53 = vadd.f32 %v312_v39, %v292_v36 }
  0x48   :  { %s945_s15 = sld [smem:[#allocation3 + $0x384]]  ;;  %v323_v49 = vstv %s927_s10  ;;  %v321_v54 = vmul.f32 %v320_v48, %v310_v27  ;;  %v316_v59 = vadd.f32 %v315_v46, %v295_v44 }
  0x49   :  { %s949_s3 = sld [smem:[#allocation3 + $0x385]]  ;;  %v324_v56 = vmul.f32 %v323_v49, %v310_v27  ;;  %v326_v57 = vstv %s931_s11  ;;  %v319_v60 = vadd.f32 %v318_v47, %v298_v45 }
  0x4a   :  { %s951_s16 = sld [smem:[#allocation7]]  ;;  %v332_v58 = vstv %s933_s12  ;;  %v327_v61 = vmul.f32 %v326_v57, %v310_v27  ;;  %v322_v1 = vadd.f32 %v321_v54, %v301_v51 }
  0x4b   :  { %s955_s17 = sld [smem:[#allocation7 + $0x1]]  ;;  %v333_v62 = vmul.f32 %v332_v58, %v331_v50  ;;  %v335_v63 = vstv %s937_s13  ;;  %v325_v5 = vadd.f32 %v324_v56, %v304_v52 }
  0x4c   :  { %s957_s18 = sld [smem:[#allocation7 + $0x2]]  ;;  %v338_v0 = vstv %s939_s1  ;;  %v336_v3 = vmul.f32 %v335_v63, %v331_v50  ;;  %v328_v6 = vadd.f32 %v327_v61, %v307_v55 }
  0x4d   :  { %s961_s19 = sld [smem:[#allocation7 + $0x3]]  ;;  %v334_v2 = vadd.f32 %v333_v62, %v313_v53  ;;  %v339_v4 = vmul.f32 %v338_v0, %v331_v50  ;;  %v341_v7 = vstv %s943_s14 }
  0x4e   :  { %s963_s20 = sld [smem:[#allocation7 + $0x4]]  ;;  %v344_v8 = vstv %s945_s15  ;;  %v337_v9 = vadd.f32 %v336_v3, %v316_v59  ;;  %v342_v11 = vmul.f32 %v341_v7, %v331_v50 }
  0x4f   :  { %s967_s0 = sld [smem:[#allocation7 + $0x5]]  ;;  %v340_v10 = vadd.f32 %v339_v4, %v319_v60  ;;  %v345_v12 = vmul.f32 %v344_v8, %v331_v50  ;;  %v347_v13 = vstv %s949_s3 }
  0x50   :  { %s969_s21 = sld [smem:[#allocation9]]  ;;  %v350_v14 = vstv %s951_s16  ;;  %v343_v15 = vadd.f32 %v342_v11, %v322_v1  ;;  %v348_v16 = vmul.f32 %v347_v13, %v331_v50 }
  0x51   :  { %s973_s22 = sld [smem:[#allocation9 + $0x1]]  ;;  %v351_v17 = vadd.f32 %v350_v14, %v334_v2  ;;  %v346_v18 = vadd.f32 %v345_v12, %v325_v5  ;;  %v356_v19 = vstv %s955_s17 }
  0x52   :  { %s975_s2 = sld [smem:[#allocation9 + $0x2]]  ;;  %v362_v20 = vstv %s957_s18  ;;  %v349_v21 = vadd.f32 %v348_v16, %v328_v6  ;;  %v357_v23 = vadd.f32 %v356_v19, %v337_v9 }
  0x53   :  { %s979_s23 = sld [smem:[#allocation9 + $0x3]]  ;;  %v352_v22 = vmul.f32 0.5, %v351_v17  ;;  %v363_v24 = vadd.f32 %v362_v20, %v340_v10  ;;  %v368_v25 = vstv %s961_s19 }
  0x54   :  { %s981_s4 = sld [smem:[#allocation9 + $0x80]]  ;;  %v374_v26 = vstv %s963_s20  ;;  %v358_v27 = vmul.f32 0.5, %v357_v23  ;;  %v369_v29 = vadd.f32 %v368_v25, %v343_v15 }
  0x55   :  { %s985_s6 = sld [smem:[#allocation9 + $0x81]]  ;;  %613 = vtanh.f32 %v352_v22  ;;  %v364_v28 = vmul.f32 0.5, %v363_v24  ;;  %v375_v30 = vadd.f32 %v374_v26, %v346_v18  ;;  %v380_v31 = vstv %s967_s0 }
  0x56   :  { %s987_s24 = sld [smem:[#allocation9 + $0x82]]  ;;  %615 = vtanh.f32 %v358_v27  ;;  %v370_v32 = vmul.f32 0.5, %v369_v29  ;;  %v381_v33 = vadd.f32 %v380_v31, %v349_v21  ;;  %v386_v38 = vstv %s969_s21 }
  0x57   :  { %s990_s25 = sld [smem:[#allocation9 + $0x83]]  ;;  %617 = vtanh.f32 %v364_v28  ;;  %v376_v34 = vmul.f32 0.5, %v375_v30  ;;  %v409_v41 = vstv %s973_s22 }
  0x58   :  { %s992_s26 = sld [smem:[#allocation9 + $0x100]]  ;;  %619 = vtanh.f32 %v370_v32  ;;  %v382_v35 = vmul.f32 0.5, %v381_v33  ;;  %v432_v42 = vstv %s975_s2 }
  0x59   :  { %s994_s27 = sld [smem:[#allocation9 + $0x101]]  ;;  %621 = vtanh.f32 %v376_v34  ;;  %v455_v43 = vstv %s979_s23 }
  0x5a   :  { %s996_s28 = sld [smem:[#allocation9 + $0x102]]  ;;  %623 = vtanh.f32 %v382_v35  ;;  %v388_v40 = vstv %s981_s4 }
  0x5b   :  { %v614_v36 = vpop.eup %613  ;;  %s998_s29 = sld [smem:[#allocation9 + $0x103]]  ;;  %v411_v47 = vstv %s985_s6  ;;  %s761_s6 = smov [#allocation14]  }
  0x5c   :  { %s1000_s30 = sld [smem:[#allocation9 + $0x180]]  ;;  %v354_v37 = vmul.f32 0.5, %v614_v36  ;;  %v616_v39 = vpop.eup %615  ;;  %v434_v48 = vstv %s987_s24  ;;  %s501_s24 = sshll.u32 %s761_s6, 4  ;;  %s502_s24 = int_to_ptr.vmem [resolvable:$true] %s501_s24 }
  0x5d   :  { %s1003_s8 = sld [smem:[#allocation9 + $0x181]]  ;;  %v618_v44 = vpop.eup %617  ;;  %v360_v46 = vmul.f32 0.5, %v616_v39  ;;  %v457_v53 = vstv %s990_s25 }
  0x5e   :  { %s1009_s9 = sld [smem:[#allocation9 + $0x182]]  ;;  %v355_v45 = vadd.f32 0.5, %v354_v37  ;;  %v620_v49 = vpop.eup %619  ;;  %v366_v50 = vmul.f32 0.5, %v618_v44  ;;  %v391_v51 = vstv %s992_s26 }
  0x5f   :  { %s1013_s10 = sld [smem:[#allocation9 + $0x183]]  ;;  %v414_v52 = vstv %s994_s27  ;;  %v622_v54 = vpop.eup %621  ;;  %v361_v55 = vadd.f32 0.5, %v360_v46  ;;  %v372_v56 = vmul.f32 0.5, %v620_v49  ;;  %s503_s27 = sshll.u32 %s1073_s7, 4  ;;  %s504_s27 = int_to_ptr.hbm [resolvable:$true] %s503_s27 }
  0x60   :  { %s1018_s11 = sld [smem:[#allocation9 + $0x200]]  ;;  %v387_v57 = vmul.f32 %v386_v38, %v355_v45  ;;  %v410_v58 = vmul.f32 %v409_v41, %v355_v45  ;;  %v624_v59 = vpop.eup %623  ;;  %v367_v60 = vadd.f32 0.5, %v366_v50  ;;  %v378_v61 = vmul.f32 0.5, %v622_v54 }
  0x61   :  { %s1020_s12 = sld [smem:[#allocation9 + $0x201]]  ;;  %v433_v62 = vmul.f32 %v432_v42, %v355_v45  ;;  %v437_v63 = vstv %s996_s28  ;;  %v373_v0 = vadd.f32 0.5, %v372_v56  ;;  %v384_v1 = vmul.f32 0.5, %v624_v59 }
  0x62   :  { %s1023_s13 = sld [smem:[#allocation9 + $0x202]]  ;;  %v389_v2 = vmul.f32 %v388_v40, %v361_v55  ;;  %v394_v3 = vstv %s1000_s30  ;;  %v379_v4 = vadd.f32 0.5, %v378_v61  ;;  %v392_v5 = vmul.f32 %v391_v51, %v367_v60 }
  0x63   :  { %s1026_s1 = sld [smem:[#allocation9 + $0x203]]  ;;  %v412_v6 = vmul.f32 %v411_v47, %v361_v55  ;;  %v415_v7 = vmul.f32 %v414_v52, %v367_v60  ;;  %v385_v8 = vadd.f32 0.5, %v384_v1  ;;  %v395_v10 = vmul.f32 %v394_v3, %v373_v0 }
  0x64   :  { %s1028_s14 = sld [smem:[#allocation9 + $0x280]]  ;;  %v390_v9 = vadd.f32 %v389_v2, %v387_v57  ;;  %v417_v11 = vstv %s1003_s8  ;;  %v435_v14 = vmul.f32 %v434_v48, %v361_v55  ;;  %v438_v15 = vmul.f32 %v437_v63, %v367_v60 }
  0x65   :  { %s1031_s15 = sld [smem:[#allocation9 + $0x281]]  ;;  %v413_v12 = vadd.f32 %v412_v6, %v410_v58  ;;  %v418_v13 = vmul.f32 %v417_v11, %v373_v0  ;;  %v440_v18 = vstv %s1009_s9  ;;  %v456_v19 = vmul.f32 %v455_v43, %v355_v45 }
  0x66   :  { %s1033_s3 = sld [smem:[#allocation9 + $0x282]]  ;;  %v393_v16 = vadd.f32 %v392_v5, %v390_v9  ;;  %v397_v17 = vstv %s1018_s11  ;;  %v436_v23 = vadd.f32 %v435_v14, %v433_v62  ;;  %v441_v26 = vmul.f32 %v440_v18, %v373_v0 }
  0x67   :  { %s1037_s16 = sld [smem:[#allocation9 + $0x283]]  ;;  %v398_v20 = vmul.f32 %v397_v17, %v379_v4  ;;  %v416_v21 = vadd.f32 %v415_v7, %v413_v12  ;;  %v420_v22 = vstv %s1020_s12  ;;  %v458_v31 = vmul.f32 %v457_v53, %v361_v55 }
  0x68   :  { %s1040_s17 = sld [smem:[#allocation10]]  ;;  %v396_v24 = vadd.f32 %v395_v10, %v393_v16  ;;  %v421_v25 = vmul.f32 %v420_v22, %v379_v4  ;;  %v443_v27 = vstv %s1023_s13  ;;  %v439_v29 = vadd.f32 %v438_v15, %v436_v23 }
  0x69   :  { %s1043_s18 = sld [smem:[#allocation10 + $0x1]]  ;;  %v419_v28 = vadd.f32 %v418_v13, %v416_v21  ;;  %v444_v30 = vmul.f32 %v443_v27, %v379_v4  ;;  %v460_v34 = vstv %s998_s29  ;;  %v463_v35 = vstv %s1013_s10 }
  0x6a   :  { %s1045_s19 = sld [smem:[#allocation10 + $0x2]]  ;;  %v399_v32 = vadd.f32 %v398_v20, %v396_v24  ;;  %v400_v33 = vstv %s1028_s14  ;;  %v442_v39 = vadd.f32 %v441_v26, %v439_v29  ;;  %v459_v42 = vadd.f32 %v458_v31, %v456_v19 }
  0x6b   :  { %s1050_s20 = sld [smem:[#allocation10 + $0x3]]  ;;  %v401_v36 = vmul.f32 %v400_v33, %v385_v8  ;;  %v422_v37 = vadd.f32 %v421_v25, %v419_v28  ;;  %v423_v38 = vstv %s1031_s15  ;;  %v461_v43 = vmul.f32 %v460_v34, %v367_v60 }
  0x6c   :  { %v424_v40 = vmul.f32 %v423_v38, %v385_v8  ;;  %v446_v41 = vstv %s1033_s3  ;;  %v445_v45 = vadd.f32 %v444_v30, %v442_v39  ;;  %v464_v47 = vmul.f32 %v463_v35, %v373_v0  ;;  %s185_s0 = sld [smem:[#allocation12]] }
  0x6d   :  { %v402_v44 = vadd.f32 %v401_v36, %v399_v32  ;;  %v447_v46 = vmul.f32 %v446_v41, %v385_v8  ;;  %v462_v50 = vadd.f32 %v461_v43, %v459_v42  ;;  %v466_v51 = vstv %s1026_s1  ;;  %s601_s21 = sld [smem:[#allocation12 + $0x80]] }
  0x6e   :  { %v403_v48 = vstv %s1040_s17  ;;  %v425_v49 = vadd.f32 %v424_v40, %v422_v37  ;;  %v467_v55 = vmul.f32 %v466_v51, %v379_v4  ;;  %v469_v59 = vstv %s1037_s16  ;;  %s602_s22 = sld [smem:[#allocation12 + $0x100]] }
  0x6f   :  { %v404_v52 = vadd.f32 %v403_v48, %v402_v44  ;;  %v426_v53 = vstv %s1043_s18  ;;  %v448_v54 = vadd.f32 %v447_v46, %v445_v45  ;;  %v465_v58 = vadd.f32 %v464_v47, %v462_v50  ;;  %s603_s2 = sld [smem:[#allocation12 + $0x180]] }
  0x70   :  { %v427_v56 = vadd.f32 %v426_v53, %v425_v49  ;;  %v449_v57 = vstv %s1045_s19  ;;  %v470_v62 = vmul.f32 %v469_v59, %v385_v8  ;;  %v489_v28 = vstv %s1071_s5 }
  0x71   :  { %v405_v61 = vmul.f32 0.5, %v404_v52  ;;  %v450_v60 = vadd.f32 %v449_v57, %v448_v54  ;;  %v468_v1 = vadd.f32 %v467_v55, %v465_v58  ;;  %v472_v2 = vstv %s1050_s20 }
  0x72   :  { %v428_v63 = vmul.f32 0.5, %v427_v56  ;;  %v478_v11 = vstv %s185_s0 }
  0x73   :  { %625 = vtanh.f32 %v405_v61  ;;  %v451_v0 = vmul.f32 0.5, %v450_v60  ;;  %v471_v3 = vadd.f32 %v470_v62, %v468_v1  ;;  %v480_v14 = vstv %s601_s21 }
  0x74   :  { %627 = vtanh.f32 %v428_v63  ;;  %v483_v16 = vstv %s602_s22 }
  0x75   :  { %629 = vtanh.f32 %v451_v0  ;;  %v473_v5 = vadd.f32 %v472_v2, %v471_v3  ;;  %v486_v24 = vstv %s603_s2 }
  0x77   :  { %v474_v4 = vmul.f32 0.5, %v473_v5 }
  0x79   :  { %v626_v6 = vpop.eup %625  ;;  %631 = vtanh.f32 %v474_v4 }
  0x7a   :  { %v628_v7 = vpop.eup %627  ;;  %v407_v9 = vmul.f32 0.5, %v626_v6 }
  0x7b   :  { %v630_v10 = vpop.eup %629  ;;  %v430_v8 = vmul.f32 0.5, %v628_v7 }
  0x7c   :  { %v408_v12 = vadd.f32 0.5, %v407_v9  ;;  %v453_v13 = vmul.f32 0.5, %v630_v10 }
  0x7d   :  { %v431_v15 = vadd.f32 0.5, %v430_v8 }
  0x7e   :  { %v454_v17 = vadd.f32 0.5, %v453_v13  ;;  %v479_v18 = vmul.f32 %v478_v11, %v408_v12 }
  0x7f   :  { %v481_v19 = vmul.f32 %v480_v14, %v431_v15  ;;  %v632_v20 = vpop.eup %631 }
  0x80   :  { %v484_v21 = vmul.f32 %v483_v16, %v454_v17  ;;  %v476_v22 = vmul.f32 0.5, %v632_v20 }
  0x81   :  { %v482_v23 = vadd.f32 %v481_v19, %v479_v18 }
  0x82   :  { %v477_v25 = vadd.f32 0.5, %v476_v22 }
  0x83   :  { %v485_v26 = vadd.f32 %v484_v21, %v482_v23 }
  0x84   :  { %v487_v27 = vmul.f32 %v486_v24, %v477_v25 }
  0x86   :  { %v488_v29 = vadd.f32 %v487_v27, %v485_v26 }
  0x88   :  { %v490_v30 = vadd.f32 %v489_v28, %v488_v29 }
  0x8a   :  { %v491_v31 = vmul.f32 0.5, %v490_v30 }
  0x8c   :  { %633 = vtanh.f32 %v491_v31 }
  0x92   :  { %v634_v32 = vpop.eup %633 }
  0x93   :  { %v493_v33 = vmul.f32 0.5, %v634_v32 }
  0x95   :  { %v494_v34 = vadd.f32 0.5, %v493_v33 }
  0x97   :  { %495 = vst [vmem:[#allocation14] sm:$0xff] %v494_v34 }
  0x98   :  { %506 = dma.vmem_to_hbm [thread:$0]  %s502_s24, 128, %s504_s27, [#allocation5]  }
  0x99   :  { %751 = dma.done.wait [#allocation5], 128  }
  0x9a   :  { %752 = vsyncadd [#allocation5], 4294967168 }
  0x9b   :  { %511 = vsyncpa [#allocation4], 1 }
  0x9c   :  { %512 = vsyncpa [#allocation5], 1 }
  0x9d   :  { %513 = vsyncpa [#allocation6], 1 }
  0x9e   :  { %514 = vsyncpa [#allocation8], 1 }
  0x9f   :  { %515 = vsyncpa [#allocation11], 1 }

</bundles_post_ra>
